<compile_context>
chip_gen: v7x
topology: tpu7x:2x2x1
jax: 0.10.0
libtpu: 0.0.40
codegen_flags: <defaults>
</compile_context>

<pallas_src>
import functools

import jax
import jax.numpy as jnp
from jax.experimental import pallas as pl
from jax.experimental.pallas import tpu as pltpu


def _round_up(x, m):
    return ((x + m - 1) // m) * m


def ensemble_kernel(xc_ref, pool_ref, spec_ref, wk_ref, cb_ref,
                    w1a_ref, w1b_ref, b1_ref, w2_ref, b2_ref, out_ref,
                    *, n_models, f_pad, inv_n_models):
    # im2col conv for ALL models at once: bf16 x bf16 -> f32 accumulation.
    conv = jnp.dot(xc_ref[...], wk_ref[...],
                   preferred_element_type=jnp.float32)
    conv = jnp.maximum(conv + cb_ref[...], 0.0)            # (BT*T_pad, NM*F_pad) f32

    # Per-batch masked global-average pool over time as a tiny constant matmul:
    # pool_ref is (BT, BT*T_pad) f32 with 1/T_out on valid rows, 0 on padded rows
    # (padded rows carry ReLU(bias) != 0, so they MUST stay masked here).
    pooled = jnp.dot(pool_ref[...], conv,
                     preferred_element_type=jnp.float32)    # (BT, NM*F_pad) f32
    pooled_bf = pooled.astype(jnp.bfloat16)

    # fc1 conv half: per-model contraction on 128-aligned lane slices
    # (no block-diagonal zero blocks).
    h_conv = jnp.concatenate(
        [jnp.dot(pooled_bf[:, m * f_pad:(m + 1) * f_pad], w1a_ref[m],
                 preferred_element_type=jnp.float32)
         for m in range(n_models)], axis=-1)                # (BT, NM*H_pad) f32

    # fc1 spectral half + bias + ReLU.
    h = h_conv + jnp.dot(spec_ref[...], w1b_ref[...],
                         preferred_element_type=jnp.float32) + b1_ref[...]
    h = jnp.maximum(h, 0.0)

    # fc2; ensemble mean (1/n_models) applied in f32 on the accumulator,
    # mean bias added in f32.
    out = jnp.dot(h.astype(jnp.bfloat16), w2_ref[...],
                  preferred_element_type=jnp.float32)
    out_ref[...] = out * inv_n_models + b2_ref[...]         # (BT, NC_pad)


def diverse_ensemble_forward(x_nct, spec, params, *, batch_tile=8):
    """x_nct: (B, C, T) float32 (PyTorch NCW), spec: (B, S) float32."""
    wk, cb, w1a, w1b, b1, w2, b2 = params
    n_models, K, C, F = wk.shape
    B, _, T = x_nct.shape
    S = spec.shape[1]
    H = w1a.shape[2]
    NC = w2.shape[2]
    T_out = T - K + 1

    BT = batch_tile                          # batches per grid step (sublane-aligned)
    T_pad = _round_up(T_out, 8)              # sublane-align conv rows per batch
    B_pad = _round_up(B, BT)
    F_pad = _round_up(F, 128)                # lane-align per-model feature slots
    H_pad = _round_up(H, 128)
    NC_pad = _round_up(NC, 128)              # lane-dense output -> unmasked stores

    # ---- layout plumbing (one-time, outside the kernel) ----
    # channels-last + im2col columns, zero-padded to T_pad rows and B_pad batches.
    x_btc = jnp.transpose(x_nct, (0, 2, 1)).astype(jnp.float32)          # (B, T, C)
    cols = jnp.concatenate([x_btc[:, k:k + T_out, :] for k in range(K)],
                           axis=-1)                                      # (B, T_out, K*C)
    cols = jnp.pad(cols, ((0, B_pad - B), (0, T_pad - T_out), (0, 0)))
    x_cols = cols.reshape(B_pad * T_pad, K * C).astype(jnp.bfloat16)

    # per-tile pooling matrix (constant across grid steps), kept in f32.
    local_b = jnp.repeat(jnp.arange(BT), T_pad)
    local_t = jnp.tile(jnp.arange(T_pad), BT)
    pool = ((local_b[None, :] == jnp.arange(BT)[:, None]) &
            (local_t[None, :] < T_out)).astype(jnp.float32) * (1.0 / T_out)  # (BT, BT*T_pad)

    spec_p = jnp.pad(spec.astype(jnp.float32),
                     ((0, B_pad - B), (0, 0))).astype(jnp.bfloat16)       # (B_pad, S)

    # ---- lane-fuse the ensemble: pack per-model weights into 128-aligned slots ----
    wk_pad = jnp.pad(wk, ((0, 0), (0, 0), (0, 0), (0, F_pad - F)))
    wk_p = jnp.transpose(wk_pad, (1, 2, 0, 3)).reshape(
        K * C, n_models * F_pad).astype(jnp.bfloat16)                    # (K*C, NM*F_pad)
    cb_pad = jnp.pad(cb, ((0, 0), (0, 0), (0, F_pad - F)))
    cb_p = jnp.transpose(cb_pad, (1, 0, 2)).reshape(
        1, n_models * F_pad).astype(jnp.float32)                         # (1, NM*F_pad)

    # fc1 conv half stays per-model (no block-diag): (NM, F_pad, H_pad)
    w1a_p = jnp.pad(w1a, ((0, 0), (0, F_pad - F), (0, H_pad - H))).astype(jnp.bfloat16)

    w1b_pad = jnp.pad(w1b, ((0, 0), (0, 0), (0, H_pad - H)))
    w1b_p = jnp.transpose(w1b_pad, (1, 0, 2)).reshape(
        S, n_models * H_pad).astype(jnp.bfloat16)                        # (S, NM*H_pad)
    b1_pad = jnp.pad(b1, ((0, 0), (0, 0), (0, H_pad - H)))
    b1_p = jnp.transpose(b1_pad, (1, 0, 2)).reshape(
        1, n_models * H_pad).astype(jnp.float32)                         # (1, NM*H_pad)

    # fc2: ensemble mean NOT folded into bf16 weights (1/NM applied in f32 in-kernel).
    w2_pad = jnp.pad(w2, ((0, 0), (0, H_pad - H), (0, NC_pad - NC)))
    w2_p = w2_pad.reshape(n_models * H_pad, NC_pad).astype(jnp.bfloat16)  # (NM*H_pad, NC_pad)
    b2_p = jnp.pad(jnp.mean(b2, axis=0),
                   ((0, 0), (0, NC_pad - NC))).astype(jnp.float32)        # (1, NC_pad)

    const2 = lambda i: (0, 0)
    grid = (B_pad // BT,)

    kernel = functools.partial(ensemble_kernel, n_models=n_models,
                               f_pad=F_pad, inv_n_models=1.0 / n_models)

    out = pl.pallas_call(
        kernel,
        out_shape=jax.ShapeDtypeStruct((B_pad, NC_pad), jnp.float32),
        grid_spec=pltpu.PrefetchScalarGridSpec(
            num_scalar_prefetch=0,
            grid=grid,
            in_specs=[
                pl.BlockSpec((BT * T_pad, K * C), lambda i: (i, 0)),      # x_cols streams
                pl.BlockSpec((BT, BT * T_pad), const2),                   # pool (constant)
                pl.BlockSpec((BT, S), lambda i: (i, 0)),                  # spec streams
                pl.BlockSpec((K * C, n_models * F_pad), const2),          # weights: constant
                pl.BlockSpec((1, n_models * F_pad), const2),
                pl.BlockSpec((n_models, F_pad, H_pad), lambda i: (0, 0, 0)),
                pl.BlockSpec((S, n_models * H_pad), const2),
                pl.BlockSpec((1, n_models * H_pad), const2),
                pl.BlockSpec((n_models * H_pad, NC_pad), const2),
                pl.BlockSpec((1, NC_pad), const2),
            ],
            out_specs=pl.BlockSpec((BT, NC_pad), lambda i: (i, 0)),
        ),
        compiler_params=pltpu.CompilerParams(
            dimension_semantics=("parallel",),          # v7x megacore splits batch tiles
            vmem_limit_bytes=32 * 1024 * 1024,          # shrink batch_tile first on v7x
        ),
    )(x_cols, pool, spec_p, wk_p, cb_p, w1a_p, w1b_p, b1_p, w2_p, b2_p)

    return out[:B, :NC]


def reference_forward(x_nct, spec, params):
    """Pure-JAX reference of the same ensemble (per-model loop), for validation."""
    wk, cb, w1a, w1b, b1, w2, b2 = params
    x_btc = jnp.transpose(x_nct, (0, 2, 1)).astype(jnp.float32)
    B, T, C = x_btc.shape
    n_models, K, _, F = wk.shape
    T_out = T - K + 1
    outs = []
    for m in range(n_models):
        conv = jnp.zeros((B, T_out, F), jnp.float32)
        for k in range(K):
            conv = conv + jnp.einsum('btc,cf->btf', x_btc[:, k:k + T_out, :], wk[m, k])
        conv = jax.nn.relu(conv + cb[m])
        pooled = conv.mean(axis=1)
        h = jax.nn.relu(pooled @ w1a[m] + spec @ w1b[m] + b1[m])
        outs.append(h @ w2[m] + b2[m])
    return jnp.mean(jnp.stack(outs), axis=0)


def init_params(key, n_models, C, K, F, S, H, NC):
    keys = jax.random.split(key, 7)
    scale = 0.1
    wk = scale * jax.random.normal(keys[0], (n_models, K, C, F), jnp.float32)
    cb = scale * jax.random.normal(keys[1], (n_models, 1, F), jnp.float32)
    w1a = scale * jax.random.normal(keys[2], (n_models, F, H), jnp.float32)
    w1b = scale * jax.random.normal(keys[3], (n_models, S, H), jnp.float32)
    b1 = scale * jax.random.normal(keys[4], (n_models, 1, H), jnp.float32)
    w2 = scale * jax.random.normal(keys[5], (n_models, H, NC), jnp.float32)
    b2 = scale * jax.random.normal(keys[6], (n_models, 1, NC), jnp.float32)
    return (wk, cb, w1a, w1b, b1, w2, b2)


if __name__ == "__main__":
    B, C, T = 2, 4, 16          # x: (batch, channels, time)  [PyTorch NCW]
    S = 16                      # spectral feature dim
    K, F, H, NC = 3, 8, 32, 5   # conv kernel, conv filters, hidden, classes
    n_models = 3

    key = jax.random.PRNGKey(0)
    kx, ks, kp = jax.random.split(key, 3)
    x = jax.random.normal(kx, (B, C, T), jnp.float32)
    spectral_features = jax.random.normal(ks, (B, S), jnp.float32)
    params = init_params(kp, n_models, C, K, F, S, H, NC)

    out = diverse_ensemble_forward(x, spectral_features, params)
    out = jax.block_until_ready(out)

    ref = reference_forward(x, spectral_features, params)
    assert out.shape == (B, NC)
    # bf16 operands (f32 accumulation) -> relaxed tolerance vs the f32 reference.
    assert jnp.allclose(out, ref, atol=3e-2, rtol=3e-2), "mismatch vs reference"

    print("KERNEL_OK")
</pallas_src>

<mosaic_0001>
module attributes {stable_mosaic.version = 11 : i64} {
  func.func @ensemble_kernel(%arg0: i32, %arg1: memref<128x12xbf16, #tpu.memory_space<vmem>>, %arg2: memref<8x128xf32, #tpu.memory_space<vmem>>, %arg3: memref<8x16xbf16, #tpu.memory_space<vmem>>, %arg4: memref<12x384xbf16, #tpu.memory_space<vmem>>, %arg5: memref<1x384xf32, #tpu.memory_space<vmem>>, %arg6: memref<3x128x128xbf16, #tpu.memory_space<vmem>>, %arg7: memref<16x384xbf16, #tpu.memory_space<vmem>>, %arg8: memref<1x384xf32, #tpu.memory_space<vmem>>, %arg9: memref<384x128xbf16, #tpu.memory_space<vmem>>, %arg10: memref<1x128xf32, #tpu.memory_space<vmem>>, %arg11: memref<8x128xf32, #tpu.memory_space<vmem>>) attributes {dimension_semantics = [#tpu.dimension_semantics<parallel>], iteration_bounds = array<i64: 1>, scalar_prefetch = 0 : i64, scratch_operands = 0 : i64, tpu.core_type = #tpu.core_type<tc>, window_params = [{transform_indices = @transform_0, window_bounds = array<i64: 128, 12>}, {pipeline_mode = #tpu.pipeline_mode<synchronous>, transform_indices = @transform_1, window_bounds = array<i64: 8, 128>}, {transform_indices = @transform_2, window_bounds = array<i64: 8, 16>}, {pipeline_mode = #tpu.pipeline_mode<synchronous>, transform_indices = @transform_3, window_bounds = array<i64: 12, 384>}, {pipeline_mode = #tpu.pipeline_mode<synchronous>, transform_indices = @transform_4, window_bounds = array<i64: 1, 384>}, {pipeline_mode = #tpu.pipeline_mode<synchronous>, transform_indices = @transform_5, window_bounds = array<i64: 3, 128, 128>}, {pipeline_mode = #tpu.pipeline_mode<synchronous>, transform_indices = @transform_6, window_bounds = array<i64: 16, 384>}, {pipeline_mode = #tpu.pipeline_mode<synchronous>, transform_indices = @transform_7, window_bounds = array<i64: 1, 384>}, {pipeline_mode = #tpu.pipeline_mode<synchronous>, transform_indices = @transform_8, window_bounds = array<i64: 384, 128>}, {pipeline_mode = #tpu.pipeline_mode<synchronous>, transform_indices = @transform_9, window_bounds = array<i64: 1, 128>}, {transform_indices = @transform_10, window_bounds = array<i64: 8, 128>}]} {
    %c0 = arith.constant 0 : index
    %c0_0 = arith.constant 0 : index
    %0 = vector.load %arg1[%c0, %c0_0] : memref<128x12xbf16, #tpu.memory_space<vmem>>, vector<128x12xbf16>
    %c0_1 = arith.constant 0 : index
    %c0_2 = arith.constant 0 : index
    %1 = vector.load %arg4[%c0_1, %c0_2] : memref<12x384xbf16, #tpu.memory_space<vmem>>, vector<12x384xbf16>
    %cst = arith.constant dense<0.000000e+00> : vector<128x384xf32>
    %2 = tpu.matmul %0, %1, %cst {dimension_numbers = #tpu.dot_dimension_numbers<[1], [0], [0], [1], [0, 0, 1, 1], [], []>} : vector<128x12xbf16>, vector<12x384xbf16>, vector<128x384xf32> -> vector<128x384xf32>
    %c0_3 = arith.constant 0 : index
    %c0_4 = arith.constant 0 : index
    %3 = vector.load %arg5[%c0_3, %c0_4] : memref<1x384xf32, #tpu.memory_space<vmem>>, vector<1x384xf32>
    %4 = vector.broadcast %3 : vector<1x384xf32> to vector<128x384xf32>
    %5 = arith.addf %2, %4 : vector<128x384xf32>
    %cst_5 = arith.constant 0.000000e+00 : f32
    %6 = vector.broadcast %cst_5 : f32 to vector<128x384xf32>
    %7 = arith.maximumf %5, %6 : vector<128x384xf32>
    %c0_6 = arith.constant 0 : index
    %c0_7 = arith.constant 0 : index
    %8 = vector.load %arg2[%c0_6, %c0_7] : memref<8x128xf32, #tpu.memory_space<vmem>>, vector<8x128xf32>
    %cst_8 = arith.constant dense<0.000000e+00> : vector<8x384xf32>
    %9 = tpu.matmul %8, %7, %cst_8 {dimension_numbers = #tpu.dot_dimension_numbers<[1], [0], [0], [1], [0, 0, 1, 1], [], []>} : vector<8x128xf32>, vector<128x384xf32>, vector<8x384xf32> -> vector<8x384xf32>
    %10 = arith.truncf %9 : vector<8x384xf32> to vector<8x384xbf16>
    %11 = vector.extract_strided_slice %10 {offsets = [0, 0], sizes = [8, 128], strides = [1, 1]} : vector<8x384xbf16> to vector<8x128xbf16>
    %c0_9 = arith.constant 0 : index
    %c0_10 = arith.constant 0 : index
    %c0_11 = arith.constant 0 : index
    %12 = vector.load %arg6[%c0_9, %c0_10, %c0_11] : memref<3x128x128xbf16, #tpu.memory_space<vmem>>, vector<1x128x128xbf16>
    %13 = vector.shape_cast %12 : vector<1x128x128xbf16> to vector<128x128xbf16>
    %cst_12 = arith.constant dense<0.000000e+00> : vector<8x128xf32>
    %14 = tpu.matmul %11, %13, %cst_12 {dimension_numbers = #tpu.dot_dimension_numbers<[1], [0], [0], [1], [0, 0, 1, 1], [], []>} : vector<8x128xbf16>, vector<128x128xbf16>, vector<8x128xf32> -> vector<8x128xf32>
    %15 = vector.extract_strided_slice %10 {offsets = [0, 128], sizes = [8, 128], strides = [1, 1]} : vector<8x384xbf16> to vector<8x128xbf16>
    %c1 = arith.constant 1 : index
    %c0_13 = arith.constant 0 : index
    %c0_14 = arith.constant 0 : index
    %16 = vector.load %arg6[%c1, %c0_13, %c0_14] : memref<3x128x128xbf16, #tpu.memory_space<vmem>>, vector<1x128x128xbf16>
    %17 = vector.shape_cast %16 : vector<1x128x128xbf16> to vector<128x128xbf16>
    %cst_15 = arith.constant dense<0.000000e+00> : vector<8x128xf32>
    %18 = tpu.matmul %15, %17, %cst_15 {dimension_numbers = #tpu.dot_dimension_numbers<[1], [0], [0], [1], [0, 0, 1, 1], [], []>} : vector<8x128xbf16>, vector<128x128xbf16>, vector<8x128xf32> -> vector<8x128xf32>
    %19 = vector.extract_strided_slice %10 {offsets = [0, 256], sizes = [8, 128], strides = [1, 1]} : vector<8x384xbf16> to vector<8x128xbf16>
    %c2 = arith.constant 2 : index
    %c0_16 = arith.constant 0 : index
    %c0_17 = arith.constant 0 : index
    %20 = vector.load %arg6[%c2, %c0_16, %c0_17] : memref<3x128x128xbf16, #tpu.memory_space<vmem>>, vector<1x128x128xbf16>
    %21 = vector.shape_cast %20 : vector<1x128x128xbf16> to vector<128x128xbf16>
    %cst_18 = arith.constant dense<0.000000e+00> : vector<8x128xf32>
    %22 = tpu.matmul %19, %21, %cst_18 {dimension_numbers = #tpu.dot_dimension_numbers<[1], [0], [0], [1], [0, 0, 1, 1], [], []>} : vector<8x128xbf16>, vector<128x128xbf16>, vector<8x128xf32> -> vector<8x128xf32>
    %23 = tpu.concatenate %14, %18, %22 in 1 : vector<8x128xf32>, vector<8x128xf32>, vector<8x128xf32> -> vector<8x384xf32>
    %c0_19 = arith.constant 0 : index
    %c0_20 = arith.constant 0 : index
    %24 = vector.load %arg3[%c0_19, %c0_20] : memref<8x16xbf16, #tpu.memory_space<vmem>>, vector<8x16xbf16>
    %c0_21 = arith.constant 0 : index
    %c0_22 = arith.constant 0 : index
    %25 = vector.load %arg7[%c0_21, %c0_22] : memref<16x384xbf16, #tpu.memory_space<vmem>>, vector<16x384xbf16>
    %cst_23 = arith.constant dense<0.000000e+00> : vector<8x384xf32>
    %26 = tpu.matmul %24, %25, %cst_23 {dimension_numbers = #tpu.dot_dimension_numbers<[1], [0], [0], [1], [0, 0, 1, 1], [], []>} : vector<8x16xbf16>, vector<16x384xbf16>, vector<8x384xf32> -> vector<8x384xf32>
    %27 = arith.addf %23, %26 : vector<8x384xf32>
    %c0_24 = arith.constant 0 : index
    %c0_25 = arith.constant 0 : index
    %28 = vector.load %arg8[%c0_24, %c0_25] : memref<1x384xf32, #tpu.memory_space<vmem>>, vector<1x384xf32>
    %29 = vector.broadcast %28 : vector<1x384xf32> to vector<8x384xf32>
    %30 = arith.addf %27, %29 : vector<8x384xf32>
    %cst_26 = arith.constant 0.000000e+00 : f32
    %31 = vector.broadcast %cst_26 : f32 to vector<8x384xf32>
    %32 = arith.maximumf %30, %31 : vector<8x384xf32>
    %33 = arith.truncf %32 : vector<8x384xf32> to vector<8x384xbf16>
    %c0_27 = arith.constant 0 : index
    %c0_28 = arith.constant 0 : index
    %34 = vector.load %arg9[%c0_27, %c0_28] : memref<384x128xbf16, #tpu.memory_space<vmem>>, vector<384x128xbf16>
    %cst_29 = arith.constant dense<0.000000e+00> : vector<8x128xf32>
    %35 = tpu.matmul %33, %34, %cst_29 {dimension_numbers = #tpu.dot_dimension_numbers<[1], [0], [0], [1], [0, 0, 1, 1], [], []>} : vector<8x384xbf16>, vector<384x128xbf16>, vector<8x128xf32> -> vector<8x128xf32>
    %cst_30 = arith.constant 0.333333343 : f32
    %36 = vector.broadcast %cst_30 : f32 to vector<8x128xf32>
    %37 = arith.mulf %35, %36 : vector<8x128xf32>
    %c0_31 = arith.constant 0 : index
    %c0_32 = arith.constant 0 : index
    %38 = vector.load %arg10[%c0_31, %c0_32] : memref<1x128xf32, #tpu.memory_space<vmem>>, vector<1x128xf32>
    %39 = vector.broadcast %38 : vector<1x128xf32> to vector<8x128xf32>
    %40 = arith.addf %37, %39 : vector<8x128xf32>
    %c0_33 = arith.constant 0 : index
    %c0_34 = arith.constant 0 : index
    %41 = vector.load %arg11[%c0_33, %c0_34] : memref<8x128xf32, #tpu.memory_space<vmem>>, vector<8x128xf32>
    tpu.vector_store %arg11[%c0_33, %c0_34], %40 {strides = array<i32>} : memref<8x128xf32, #tpu.memory_space<vmem>>, vector<8x128xf32>,
    return
  }
  func.func @transform_0(%arg0: i32) -> (i32, i32) {
    %c0_i32 = arith.constant 0 : i32
    %c0_i32_0 = arith.constant 0 : i32
    return %arg0, %c0_i32 : i32, i32
  }
  func.func @transform_1(%arg0: i32) -> (i32, i32) {
    %c0_i32 = arith.constant 0 : i32
    %c0_i32_0 = arith.constant 0 : i32
    %c0_i32_1 = arith.constant 0 : i32
    return %c0_i32, %c0_i32_0 : i32, i32
  }
  func.func @transform_2(%arg0: i32) -> (i32, i32) {
    %c0_i32 = arith.constant 0 : i32
    %c0_i32_0 = arith.constant 0 : i32
    return %arg0, %c0_i32 : i32, i32
  }
  func.func @transform_3(%arg0: i32) -> (i32, i32) {
    %c0_i32 = arith.constant 0 : i32
    %c0_i32_0 = arith.constant 0 : i32
    %c0_i32_1 = arith.constant 0 : i32
    return %c0_i32, %c0_i32_0 : i32, i32
  }
  func.func @transform_4(%arg0: i32) -> (i32, i32) {
    %c0_i32 = arith.constant 0 : i32
    %c0_i32_0 = arith.constant 0 : i32
    %c0_i32_1 = arith.constant 0 : i32
    return %c0_i32, %c0_i32_0 : i32, i32
  }
  func.func @transform_5(%arg0: i32) -> (i32, i32, i32) {
    %c0_i32 = arith.constant 0 : i32
    %c0_i32_0 = arith.constant 0 : i32
    %c0_i32_1 = arith.constant 0 : i32
    %c0_i32_2 = arith.constant 0 : i32
    return %c0_i32, %c0_i32_0, %c0_i32_1 : i32, i32, i32
  }
  func.func @transform_6(%arg0: i32) -> (i32, i32) {
    %c0_i32 = arith.constant 0 : i32
    %c0_i32_0 = arith.constant 0 : i32
    %c0_i32_1 = arith.constant 0 : i32
    return %c0_i32, %c0_i32_0 : i32, i32
  }
  func.func @transform_7(%arg0: i32) -> (i32, i32) {
    %c0_i32 = arith.constant 0 : i32
    %c0_i32_0 = arith.constant 0 : i32
    %c0_i32_1 = arith.constant 0 : i32
    return %c0_i32, %c0_i32_0 : i32, i32
  }
  func.func @transform_8(%arg0: i32) -> (i32, i32) {
    %c0_i32 = arith.constant 0 : i32
    %c0_i32_0 = arith.constant 0 : i32
    %c0_i32_1 = arith.constant 0 : i32
    return %c0_i32, %c0_i32_0 : i32, i32
  }
  func.func @transform_9(%arg0: i32) -> (i32, i32) {
    %c0_i32 = arith.constant 0 : i32
    %c0_i32_0 = arith.constant 0 : i32
    %c0_i32_1 = arith.constant 0 : i32
    return %c0_i32, %c0_i32_0 : i32, i32
  }
  func.func @transform_10(%arg0: i32) -> (i32, i32) {
    %c0_i32 = arith.constant 0 : i32
    %c0_i32_0 = arith.constant 0 : i32
    return %arg0, %c0_i32 : i32, i32
  }
}

</mosaic_0001>

<bundles_post_ra>
// kernel: tpu_custom_call.1
= control target key start
LH: loop header
LB: loop body
LE: loop exit
PB: predicated region body
PF: predicated region fallthrough
CT: control target
= control target key end

     0   :  { %15 = vsyncpa [#allocation3], 0  ;;  %s2158_s0 = inlined_call_operand.vmem [shape: bf16[128,12], index: 0, kind: input, shape index: {}]   ;;  %s2159_s1 = inlined_call_operand.vmem [shape: f32[8,128], index: 1, kind: input, shape index: {}]   ;;  %s2160_s2 = inlined_call_operand.vmem [shape: bf16[8,16], index: 2, kind: input, shape index: {}]   ;;  %s2161_s3 = inlined_call_operand.vmem [shape: bf16[12,384], index: 3, kind: input, shape index: {}]   ;;  %s2162_s4 = inlined_call_operand.vmem [shape: f32[1,384], index: 4, kind: input, shape index: {}]   ;;  %s2163_s5 = inlined_call_operand.hbm [shape: bf16[3,128,128], index: 5, kind: input, shape index: {}]   ;;  %s2164_s6 = inlined_call_operand.vmem [shape: bf16[16,384], index: 6, kind: input, shape index: {}]   ;;  %s2165_s7 = inlined_call_operand.vmem [shape: f32[1,384], index: 7, kind: input, shape index: {}]   ;;  %s2166_s8 = inlined_call_operand.hbm [shape: bf16[384,128], index: 8, kind: input, shape index: {}]   ;;  %s2167_s9 = inlined_call_operand.vmem [shape: f32[1,128], index: 9, kind: input, shape index: {}]   ;;  %s2168_s10 = inlined_call_operand.hbm [shape: f32[8,128], index: 10, kind: output, shape index: {}]  }
   0x1   :  { %16 = vsyncpa [#allocation6], 0 }
   0x2   :  { %17 = vsyncpa [#allocation4], 0  ;;  %s1849_s13 = smov [#allocation2]   ;;  %s1777_s17 = scalar_lea.hbm %s2163_s5, 3072 }
   0x3   :  { %s33_s14 = sshll.u32 %s1849_s13, 4  ;;  %p1778_p0 = scmp.ne.s32.totalorder %s2163_s5, %s1777_s17  ;;  %s34_s14 = int_to_ptr.vmem [resolvable:$true] %s33_s14 }
   0x4   :  { %p1781_p1 = scmp.lt.u32.totalorder %s1777_s17, %s2163_s5 }
   0x6   :  { %p1783_p2 = pnand %p1781_p1, %p1778_p0 }
   0x8   :  { %1786 = shalt.err (!%p1783_p2)
}
   0x9   :  { %s1787_s22 = scalar_lea.vmem %s34_s14, 3072  ;;  %p1792_p4 = scmp.lt.s32.totalorder %s34_s14, %s34_s14 }
   0xa   :  { %p1788_p3 = scmp.ne.s32.totalorder %s34_s14, %s1787_s22  ;;  %p1793_p5 = scmp.lt.s32.totalorder %s1787_s22, %s1787_s22 }
   0xc   :  { %p1794_p6 = por %p1793_p5, %p1792_p4 }
   0xe   :  { %p1795_p7 = pnand %p1794_p6, %p1788_p3 }
  0x10   :  { %1798 = shalt.err (!%p1795_p7)
}
  0x11   :  { %s1850_s23 = smov 64   ;;  %s1851_s24 = smov 4  }
  0x12   :  { %39 = dma.hbm_to_vmem [thread:$0]  %s2163_s5, 3072, %s34_s14, [#allocation3], %s1850_s23, %s1850_s23, %s1851_s24  }
  0x13   :  { %s1852_s27 = smov [#allocation5]   ;;  %s1799_s11 = scalar_lea.hbm %s2166_s8, 3072 }
  0x14   :  { %s49_s28 = sshll.u32 %s1852_s27, 4  ;;  %p1800_p8 = scmp.ne.s32.totalorder %s2166_s8, %s1799_s11  ;;  %s50_s28 = int_to_ptr.vmem [resolvable:$true] %s49_s28 }
  0x15   :  { %p1803_p9 = scmp.lt.u32.totalorder %s1799_s11, %s2166_s8 }
  0x17   :  { %p1805_p10 = pnand %p1803_p9, %p1800_p8 }
  0x19   :  { %1808 = shalt.err (!%p1805_p10)
}
  0x1a   :  { %s1809_s17 = scalar_lea.vmem %s50_s28, 3072  ;;  %p1814_p12 = scmp.lt.s32.totalorder %s50_s28, %s50_s28 }
  0x1b   :  { %p1810_p11 = scmp.ne.s32.totalorder %s50_s28, %s1809_s17  ;;  %p1815_p13 = scmp.lt.s32.totalorder %s1809_s17, %s1809_s17 }
  0x1d   :  { %p1816_p0 = por %p1815_p13, %p1814_p12 }
  0x1f   :  { %p1817_p1 = pnand %p1816_p0, %p1810_p11 }
  0x21   :  { %1820 = shalt.err (!%p1817_p1)
}
  0x22   :  { %55 = dma.hbm_to_vmem [thread:$0]  %s2166_s8, 3072, %s50_s28, [#allocation6], %s1850_s23, %s1850_s23, %s1851_s24  }
  0x23   :  { %1843 = dma.done.wait [#allocation3], 3072  }
  0x24   :  { %1844 = vsyncadd [#allocation3], 4294964224 }
  0x25   :  { %1845 = dma.done.wait [#allocation6], 3072  }
  0x26   :  { %1846 = vsyncadd [#allocation6], 4294964224  ;;  %v1853_v0 = vmov 0   ;;  %vm180_vm0 = vcmask 1045504   ;;  %vm155_vm1 = vcmask 97280   ;;  %v1716_v3 = vld [vmem:[%s2158_s0] sm:$0xff]   ;;  %v87_v16 = vlaneseq }
  0x27   :  { %222 = vmatprep.mubr.bf16.mxu0 %v1853_v0  ;;  %v1713_v1 = vld [vmem:[%s2161_s3 + $0x4] ss:$12 sps:$4 sm:$0x3f]   ;;  %v1715_v2 = vld [vmem:[%s2161_s3] ss:$12 sps:$4 sm:$0x3f]   ;;  %1510 = vmatprep.mubr.msk.bf16.mxu1 %vm155_vm1, %v1716_v3 }
  0x28   :  { %1351 = vmatprep.subr.msk.bf16.mxu0 %vm180_vm0, %v1713_v1  ;;  %v182_v4 = vsel %vm180_vm0, %v1715_v2, 0  ;;  %v1719_v5 = vld [vmem:[%s2161_s3 + $0x8] ss:$12 sps:$4 sm:$0x3f]   ;;  %v1720_v9 = vld [vmem:[%s2158_s0 + $0x18] sm:$0xff]   ;;  %v1721_v10 = vld [vmem:[%s2158_s0 + $0x20] sm:$0xff]  }
  0x29   :  { %191 = vmatpush1.bf16.msra.mxu0 %v182_v4  ;;  %1703 = vmatprep.subr.msk.bf16.mxu1 %vm180_vm0, %v1719_v5  ;;  %v188_v6 = vsel %vm180_vm0, %v1719_v5, 0  ;;  %v1717_v7 = vld [vmem:[%s2158_s0 + $0x8] sm:$0xff]   ;;  %v1718_v8 = vld [vmem:[%s2158_s0 + $0x10] sm:$0xff]   ;;  %v1724_v13 = vld [vmem:[%s2158_s0 + $0x38] sm:$0xff]   ;;  %v1854_v14 = vmov 0.0|0.0   ;;  %v1855_v15 = vmov 0.0  }
  0x2a   :  { %1509 = vmatpush3.bf16.msra.mxu1 %v188_v6  ;;  %v1722_v11 = vld [vmem:[%s2158_s0 + $0x28] sm:$0xff]   ;;  %v1723_v12 = vld [vmem:[%s2158_s0 + $0x30] sm:$0xff]   ;;  %1679 = vmatprep.subr.bf16.mxu0 %v1854_v14  ;;  %vm1856_vm2 = vmmov 0   ;;  %v1998_v17 = vshrl.u32 %v87_v16, 7  ;;  %v85_v19 = vld [vmem:[%s2162_s4] sm:$0x7] }
  0x2b   :  { %vm928_vm3 = vcmask 130048   ;;  %s1857_s26 = smov [#allocation7]  }
  0x2c   :  { %1352 = vmatmul.mubr.msk.bf16.vlgmr.msra.gmra.mrb[0].mxu0 %vm155_vm1, %v1716_v3  ;;  %v89_v18 = vsub.s32 0, %v1998_v17  ;;  %v93_v20 = vsub.s32 1, %v1998_v17  ;;  %v97_v23 = vsub.s32 2, %v1998_v17  ;;  %v1421_v17 = vld [vmem:[%s2167_s9] ss:$0 sm:$0xff]  ;;  %s1330_s27 = sshll.u32 %s1857_s26, 4  ;;  %s1331_s27 = int_to_ptr.vmem [resolvable:$true] %s1330_s27 }
  0x2d   :  { %232 = vmatprep.mubr.bf16.mxu0 %v1853_v0  ;;  %1511 = vmatmul.mubr.msk.bf16.vlgmr.msra.gmra.mrb[0].mxu1 %vm155_vm1, %v1717_v7  ;;  %s1821_s28 = scalar_lea.vmem %s1331_s27, 128  ;;  %p1826_p3 = scmp.lt.s32.totalorder %s1331_s27, %s1331_s27 }
  0x2e   :  { %1514 = vmatprep.mubr.msk.bf16.mxu1 %vm155_vm1, %v1718_v8  ;;  %v2007_v21 = vrot.slane %v85_v19, %v89_v18  ;;  %v2011_v22 = vrot.slane %v85_v19, %v93_v20  ;;  %v2018_v29 = vrot.slane %v85_v19, %v97_v23  ;;  %p1822_p2 = scmp.ne.s32.totalorder %s1331_s27, %s1821_s28  ;;  %p1827_p4 = scmp.lt.s32.totalorder %s1821_s28, %s1821_s28 }
  0x30   :  { %p1828_p5 = por %p1827_p4, %p1826_p3 }
  0x32   :  { %p1829_p6 = pnand %p1828_p5, %p1822_p2 }
  0x34   :  { %1353 = vmatmul.mubr.msk.bf16.gmra.mrb[4].mxu0 %vm155_vm1, %v1717_v7 }
  0x35   :  { %242 = vmatprep.mubr.bf16.mxu0 %v1853_v0  ;;  %1515 = vmatmul.mubr.msk.bf16.gmra.mrb[4].mxu1 %vm155_vm1, %v1720_v9 }
  0x36   :  { %1518 = vmatprep.mubr.msk.bf16.mxu1 %vm155_vm1, %v1721_v10 }
  0x3c   :  { %1354 = vmatmul.mubr.msk.bf16.gmra.mrb[8].mxu0 %vm155_vm1, %v1718_v8 }
  0x3d   :  { %252 = vmatprep.mubr.bf16.mxu0 %v1853_v0  ;;  %1519 = vmatmul.mubr.msk.bf16.gmra.mrb[8].mxu1 %vm155_vm1, %v1722_v11 }
  0x3e   :  { %1522 = vmatprep.mubr.msk.bf16.mxu1 %vm155_vm1, %v1723_v12 }
  0x44   :  { %1355 = vmatmul.mubr.msk.bf16.gmra.mrb[12].mxu0 %vm155_vm1, %v1720_v9 }
  0x45   :  { %262 = vmatprep.mubr.bf16.mxu0 %v1853_v0  ;;  %1523 = vmatmul.mubr.msk.bf16.gmra.mrb[12].mxu1 %vm155_vm1, %v1724_v13 }
  0x46   :  { %513 = vmatprep.mubr.f32.mxu1 %v1855_v15 }
  0x4c   :  { %1356 = vmatmul.mubr.msk.bf16.gmra.mrb[16].mxu0 %vm155_vm1, %v1721_v10 }
  0x4d   :  { %272 = vmatprep.mubr.bf16.mxu0 %v1853_v0 }
  0x54   :  { %1357 = vmatmul.mubr.msk.bf16.gmra.mrb[20].mxu0 %vm155_vm1, %v1722_v11 }
  0x55   :  { %282 = vmatprep.mubr.bf16.mxu0 %v1853_v0 }
  0x5c   :  { %1358 = vmatmul.mubr.msk.bf16.gmra.mrb[24].mxu0 %vm155_vm1, %v1723_v12 }
  0x5d   :  { %292 = vmatprep.mubr.bf16.mxu0 %v1853_v0 }
  0x64   :  { %1359 = vmatmul.mubr.msk.bf16.gmra.mrb[28].mxu0 %vm155_vm1, %v1724_v13 }
  0x65   :  { %1558 = vmatprep.mubr.msk.f32.mxu0 %vm1856_vm2, %v1855_v15 }
  0xff   :  { %v224_v24 = vpop.f32.mrb[0].mxu0 }
 0x100   :  { %v225_v25 = vadd.f32 %v224_v24, %v2007_v21  ;;  %v226_v26 = vpop.f32.mrb[1].mxu0  ;;  %v1512_v33 = vpop.f32.mrb[0].mxu1 }
 0x101   :  { %v227_v27 = vadd.f32 %v226_v26, %v2011_v22  ;;  %v228_v28 = vpop.f32.mrb[2].mxu0  ;;  %v346_v36 = vadd.f32 %v1512_v33, %v2018_v29  ;;  %v337_v37 = vpop.f32.mrb[1].mxu1 }
 0x102   :  { %v229_v30 = vadd.f32 %v228_v28, %v2007_v21  ;;  %v230_v31 = vpop.f32.mrb[3].mxu0  ;;  %v400_v34 = vmax.f32 %v225_v25, 0.0  ;;  %v338_v40 = vadd.f32 %v337_v37, %v2018_v29  ;;  %v1513_v41 = vpop.f32.mrb[2].mxu1 }
 0x103   :  { %v231_v32 = vadd.f32 %v230_v31, %v2011_v22  ;;  %v401_v38 = vmax.f32 %v227_v27, 0.0  ;;  %v408_v43 = vmax.f32 %v346_v36, 0.0  ;;  %v349_v44 = vadd.f32 %v1513_v41, %v2018_v29  ;;  %v340_v45 = vpop.f32.mrb[3].mxu1 }
 0x104   :  { %v403_v35 = vmax.f32 %v229_v30, 0.0  ;;  %v402_v48 = vmax.f32 %v338_v40, 0.0  ;;  %v341_v49 = vadd.f32 %v340_v45, %v2018_v29 }
 0x105   :  { %v404_v39 = vmax.f32 %v231_v32, 0.0  ;;  %v411_v52 = vmax.f32 %v349_v44, 0.0 }
 0x106   :  { %v1649_v42 = vpack.c.bf16 %v403_v35, %v400_v34  ;;  %v405_v55 = vmax.f32 %v341_v49, 0.0 }
 0x107   :  { %v1647_v46 = vpack.c.bf16 %v404_v39, %v401_v38  ;;  %v234_v47 = vpop.f32.mrb[4].mxu0  ;;  %v1683_v58 = vpack.c.bf16 %v411_v52, %v408_v43 }
 0x108   :  { %v235_v50 = vadd.f32 %v234_v47, %v2007_v21  ;;  %v236_v51 = vpop.f32.mrb[5].mxu0  ;;  %v1680_v60 = vpack.c.bf16 %v405_v55, %v402_v48  ;;  %v1516_v61 = vpop.f32.mrb[4].mxu1 }
 0x109   :  { %v237_v53 = vadd.f32 %v236_v51, %v2011_v22  ;;  %v238_v54 = vpop.f32.mrb[6].mxu0  ;;  %1648 = vmatprep.subr.bf16.mxu1 %v1647_v46  ;;  %v362_v1 = vadd.f32 %v1516_v61, %v2018_v29  ;;  %v353_v2 = vpop.f32.mrb[5].mxu1 }
 0x10a   :  { %v239_v56 = vadd.f32 %v238_v54, %v2007_v21  ;;  %v240_v57 = vpop.f32.mrb[7].mxu0  ;;  %1650 = vmatpush1.bf16.msra.mxu1 %v1649_v42  ;;  %v406_v62 = vmax.f32 %v235_v50, 0.0  ;;  %1681 = vmatpush3.bf16.msra.mxu0 %v1680_v60  ;;  %v354_v5 = vadd.f32 %v353_v2, %v2018_v29  ;;  %v1517_v6 = vpop.f32.mrb[6].mxu1 }
 0x10b   :  { %v241_v59 = vadd.f32 %v240_v57, %v2011_v22  ;;  %v407_v3 = vmax.f32 %v237_v53, 0.0  ;;  %1682 = vmatprep.subr.bf16.mxu0 %v1854_v14  ;;  %v420_v8 = vmax.f32 %v362_v1, 0.0  ;;  %v365_v9 = vadd.f32 %v1517_v6, %v2018_v29  ;;  %v356_v10 = vpop.f32.mrb[7].mxu1 }
 0x10c   :  { %v409_v63 = vmax.f32 %v239_v56, 0.0  ;;  %v414_v13 = vmax.f32 %v354_v5, 0.0  ;;  %v357_v16 = vadd.f32 %v356_v10, %v2018_v29 }
 0x10d   :  { %v410_v4 = vmax.f32 %v241_v59, 0.0  ;;  %v423_v25 = vmax.f32 %v365_v9, 0.0 }
 0x10e   :  { %v1653_v7 = vpack.c.bf16 %v409_v63, %v406_v62  ;;  %1684 = vmatpush3.bf16.msra.mxu0 %v1683_v58  ;;  %v417_v28 = vmax.f32 %v357_v16, 0.0 }
 0x10f   :  { %v1651_v11 = vpack.c.bf16 %v410_v4, %v407_v3  ;;  %v244_v12 = vpop.f32.mrb[8].mxu0  ;;  %v1689_v32 = vpack.c.bf16 %v423_v25, %v420_v8  ;;  %1685 = vmatprep.subr.bf16.mxu0 %v1854_v14 }
 0x110   :  { %v245_v19 = vadd.f32 %v244_v12, %v2007_v21  ;;  %v246_v24 = vpop.f32.mrb[9].mxu0  ;;  %v1686_v34 = vpack.c.bf16 %v417_v28, %v414_v13  ;;  %v1520_v35 = vpop.f32.mrb[8].mxu1 }
 0x111   :  { %v247_v26 = vadd.f32 %v246_v24, %v2011_v22  ;;  %v248_v27 = vpop.f32.mrb[10].mxu0  ;;  %1652 = vmatprep.subr.bf16.mxu1 %v1651_v11  ;;  %v378_v38 = vadd.f32 %v1520_v35, %v2018_v29  ;;  %v369_v39 = vpop.f32.mrb[9].mxu1 }
 0x112   :  { %v249_v30 = vadd.f32 %v248_v27, %v2007_v21  ;;  %v250_v31 = vpop.f32.mrb[11].mxu0  ;;  %1654 = vmatpush1.bf16.msra.mxu1 %v1653_v7  ;;  %v412_v36 = vmax.f32 %v245_v19, 0.0  ;;  %1687 = vmatpush3.bf16.msra.mxu0 %v1686_v34  ;;  %v370_v42 = vadd.f32 %v369_v39, %v2018_v29  ;;  %v1521_v43 = vpop.f32.mrb[10].mxu1 }
 0x113   :  { %v251_v33 = vadd.f32 %v250_v31, %v2011_v22  ;;  %v413_v40 = vmax.f32 %v247_v26, 0.0  ;;  %1688 = vmatprep.subr.bf16.mxu0 %v1854_v14  ;;  %v432_v45 = vmax.f32 %v378_v38, 0.0  ;;  %v381_v46 = vadd.f32 %v1521_v43, %v2018_v29  ;;  %v372_v47 = vpop.f32.mrb[11].mxu1 }
 0x114   :  { %v415_v37 = vmax.f32 %v249_v30, 0.0  ;;  %v426_v50 = vmax.f32 %v370_v42, 0.0  ;;  %v373_v51 = vadd.f32 %v372_v47, %v2018_v29  ;;  %v1726_v47 = vld [vmem:[#allocation2 + $0x40] sm:$0xff]  }
 0x115   :  { %v416_v41 = vmax.f32 %v251_v33, 0.0  ;;  %v435_v54 = vmax.f32 %v381_v46, 0.0 }
 0x116   :  { %v1657_v44 = vpack.c.bf16 %v415_v37, %v412_v36  ;;  %1690 = vmatpush3.bf16.msra.mxu0 %v1689_v32  ;;  %v429_v57 = vmax.f32 %v373_v51, 0.0 }
 0x117   :  { %v1655_v48 = vpack.c.bf16 %v416_v41, %v413_v40  ;;  %v254_v49 = vpop.f32.mrb[12].mxu0  ;;  %v1695_v60 = vpack.c.bf16 %v435_v54, %v432_v45  ;;  %1691 = vmatprep.subr.bf16.mxu0 %v1854_v14 }
 0x118   :  { %v255_v52 = vadd.f32 %v254_v49, %v2007_v21  ;;  %v256_v53 = vpop.f32.mrb[13].mxu0  ;;  %v1692_v62 = vpack.c.bf16 %v429_v57, %v426_v50  ;;  %v1524_v63 = vpop.f32.mrb[12].mxu1 }
 0x119   :  { %v257_v55 = vadd.f32 %v256_v53, %v2011_v22  ;;  %v258_v56 = vpop.f32.mrb[14].mxu0  ;;  %1656 = vmatprep.subr.bf16.mxu1 %v1655_v48  ;;  %v394_v3 = vadd.f32 %v1524_v63, %v2018_v29  ;;  %v385_v4 = vpop.f32.mrb[13].mxu1  ;;  %v1730_v63 = vld [vmem:[#allocation2 + $0x50] sm:$0xff]  }
 0x11a   :  { %v259_v58 = vadd.f32 %v258_v56, %v2007_v21  ;;  %v260_v59 = vpop.f32.mrb[15].mxu0  ;;  %1658 = vmatpush1.bf16.msra.mxu1 %v1657_v44  ;;  %v418_v1 = vmax.f32 %v255_v52, 0.0  ;;  %1693 = vmatpush3.bf16.msra.mxu0 %v1692_v62  ;;  %v386_v7 = vadd.f32 %v385_v4, %v2018_v29  ;;  %v1525_v8 = vpop.f32.mrb[14].mxu1 }
 0x11b   :  { %v261_v61 = vadd.f32 %v260_v59, %v2011_v22  ;;  %v419_v5 = vmax.f32 %v257_v55, 0.0  ;;  %1694 = vmatprep.subr.bf16.mxu0 %v1854_v14  ;;  %v444_v10 = vmax.f32 %v394_v3, 0.0  ;;  %v397_v11 = vadd.f32 %v1525_v8, %v2018_v29  ;;  %v388_v12 = vpop.f32.mrb[15].mxu1  ;;  %v1728_v55 = vld [vmem:[#allocation2 + $0x48] sm:$0xff]   ;;  %v1732_v8 = vld [vmem:[#allocation2 + $0x58] sm:$0xff]  }
 0x11c   :  { %v421_v2 = vmax.f32 %v259_v58, 0.0  ;;  %v438_v19 = vmax.f32 %v386_v7, 0.0  ;;  %v389_v24 = vadd.f32 %v388_v12, %v2018_v29 }
 0x11d   :  { %v422_v6 = vmax.f32 %v261_v61, 0.0  ;;  %v447_v27 = vmax.f32 %v397_v11, 0.0 }
 0x11e   :  { %v1661_v9 = vpack.c.bf16 %v421_v2, %v418_v1  ;;  %1696 = vmatpush3.bf16.msra.mxu0 %v1695_v60  ;;  %v441_v31 = vmax.f32 %v389_v24, 0.0  ;;  %v1734_v24 = vld [vmem:[#allocation2 + $0x60] sm:$0xff]  }
 0x11f   :  { %v1659_v13 = vpack.c.bf16 %v422_v6, %v419_v5  ;;  %v264_v16 = vpop.f32.mrb[16].mxu0  ;;  %v1701_v34 = vpack.c.bf16 %v447_v27, %v444_v10  ;;  %1697 = vmatprep.subr.bf16.mxu0 %v1854_v14 }
 0x120   :  { %v265_v25 = vadd.f32 %v264_v16, %v2007_v21  ;;  %v266_v26 = vpop.f32.mrb[17].mxu0  ;;  %v1698_v29 = vpack.c.bf16 %v441_v31, %v438_v19 }
 0x121   :  { %v267_v28 = vadd.f32 %v266_v26, %v2011_v22  ;;  %v268_v30 = vpop.f32.mrb[18].mxu0  ;;  %1660 = vmatprep.subr.bf16.mxu1 %v1659_v13 }
 0x122   :  { %v269_v32 = vadd.f32 %v268_v30, %v2007_v21  ;;  %v270_v33 = vpop.f32.mrb[19].mxu0  ;;  %1662 = vmatpush1.bf16.msra.mxu1 %v1661_v9  ;;  %v424_v36 = vmax.f32 %v265_v25, 0.0  ;;  %1699 = vmatpush3.bf16.msra.mxu0 %v1698_v29  ;;  %v1738_v29 = vld [vmem:[#allocation2 + $0x70] sm:$0xff]  }
 0x123   :  { %v271_v35 = vadd.f32 %v270_v33, %v2011_v22  ;;  %v425_v38 = vmax.f32 %v267_v28, 0.0  ;;  %1700 = vmatprep.subr.bf16.mxu0 %v1854_v14  ;;  %v448_v14 = vld [vmem:[%s2159_s1] sm:$0xff] }
 0x124   :  { %v427_v37 = vmax.f32 %v269_v32, 0.0  ;;  %v1736_v33 = vld [vmem:[#allocation2 + $0x68] sm:$0xff]  }
 0x125   :  { %v428_v39 = vmax.f32 %v271_v35, 0.0 }
 0x126   :  { %v1665_v40 = vpack.c.bf16 %v427_v37, %v424_v36  ;;  %1702 = vmatpush3.bf16.msra.mxu0 %v1701_v34  ;;  %v1729_v36 = vld [vmem:[#allocation2 + $0x10] sm:$0xff]   ;;  %v1731_v37 = vld [vmem:[#allocation2 + $0x18] sm:$0xff]  }
 0x127   :  { %v1663_v41 = vpack.c.bf16 %v428_v39, %v425_v38  ;;  %v274_v42 = vpop.f32.mrb[20].mxu0  ;;  %1581 = vmatprep.subr.bf16.mxu0 %v1855_v15  ;;  %v1733_v38 = vld [vmem:[#allocation2 + $0x20] sm:$0xff]   ;;  %v1735_v39 = vld [vmem:[#allocation2 + $0x28] sm:$0xff]  }
 0x128   :  { %v275_v43 = vadd.f32 %v274_v42, %v2007_v21  ;;  %v276_v44 = vpop.f32.mrb[21].mxu0  ;;  %v1740_v42 = vld [vmem:[#allocation2 + $0x78] sm:$0xff]  }
 0x129   :  { %v277_v45 = vadd.f32 %v276_v44, %v2011_v22  ;;  %v278_v46 = vpop.f32.mrb[22].mxu0  ;;  %1664 = vmatprep.subr.bf16.mxu1 %v1663_v41  ;;  %1559 = vmatmul.mubr.f32.vlgmr.msra.gmra.mrb[32].mxu0 %v448_v14  ;;  %v1739_v41 = vld [vmem:[#allocation2 + $0x38] sm:$0xff]  }
 0x12a   :  { %v279_v48 = vadd.f32 %v278_v46, %v2007_v21  ;;  %v280_v49 = vpop.f32.mrb[23].mxu0  ;;  %1666 = vmatpush1.bf16.msra.mxu1 %v1665_v40  ;;  %v430_v51 = vmax.f32 %v275_v43, 0.0  ;;  %1582 = vmatpush3.bf16.msra.mxu0 %v1726_v47  ;;  %v1737_v40 = vld [vmem:[#allocation2 + $0x30] sm:$0xff]   ;;  %v1745_v43 = vld [vmem:[%s2164_s6 + $0x4] ss:$12 sps:$4 sm:$0xff]   ;;  %v1741_v47 = vld [vmem:[#allocation2 + $0x80] sm:$0xff]  }
 0x12b   :  { %v281_v50 = vadd.f32 %v280_v49, %v2011_v22  ;;  %v431_v53 = vmax.f32 %v277_v45, 0.0  ;;  %1597 = vmatprep.mubr.msk.bf16.mxu0 %vm1856_vm2, %v1855_v15  ;;  %1583 = vmatprep.subr.bf16.mxu0 %v1855_v15 }
 0x12c   :  { %v433_v52 = vmax.f32 %v279_v48, 0.0 }
 0x12d   :  { %v434_v54 = vmax.f32 %v281_v50, 0.0  ;;  %v1743_v50 = vld [vmem:[%s2164_s6] ss:$12 sps:$4 sm:$0xff]  }
 0x12e   :  { %v1669_v56 = vpack.c.bf16 %v433_v52, %v430_v51  ;;  %1584 = vmatpush3.bf16.msra.mxu0 %v1728_v55  ;;  %v1753_v51 = vld [vmem:[#allocation5 + $0x40] sm:$0xff]   ;;  %v1742_v52 = vld [vmem:[#allocation2 + $0x88] sm:$0xff]  }
 0x12f   :  { %v1667_v57 = vpack.c.bf16 %v434_v54, %v431_v53  ;;  %v284_v58 = vpop.f32.mrb[24].mxu0  ;;  %1585 = vmatprep.subr.bf16.mxu0 %v1855_v15  ;;  %v1746_v53 = vld [vmem:[#allocation2 + $0x90] sm:$0xff]   ;;  %v907_v54 = vld [vmem:[%s2160_s2] sm:$0xf]  ;;  %v1754_v55 = vld [vmem:[#allocation5] sm:$0xff]  }
 0x130   :  { %v285_v59 = vadd.f32 %v284_v58, %v2007_v21  ;;  %v286_v60 = vpop.f32.mrb[25].mxu0  ;;  %v1757_v58 = vld [vmem:[#allocation5 + $0x50] sm:$0xff]  }
 0x131   :  { %v287_v61 = vadd.f32 %v286_v60, %v2011_v22  ;;  %v288_v62 = vpop.f32.mrb[26].mxu0  ;;  %1668 = vmatprep.subr.bf16.mxu1 %v1667_v57  ;;  %v1747_v57 = vld [vmem:[#allocation2 + $0x98] sm:$0xff]   ;;  %v1758_v60 = vld [vmem:[#allocation5 + $0x10] sm:$0xff]  }
 0x132   :  { %v289_v1 = vadd.f32 %v288_v62, %v2007_v21  ;;  %v290_v2 = vpop.f32.mrb[27].mxu0  ;;  %1670 = vmatpush1.bf16.msra.mxu1 %v1669_v56  ;;  %v436_v4 = vmax.f32 %v285_v59, 0.0  ;;  %1586 = vmatpush3.bf16.msra.mxu0 %v1730_v63  ;;  %v1755_v56 = vld [vmem:[#allocation5 + $0x48] sm:$0xff]   ;;  %v1748_v59 = vld [vmem:[#allocation2 + $0xa0] sm:$0xff]   ;;  %v1750_v62 = vld [vmem:[#allocation2 + $0xb0] sm:$0xff]  }
 0x133   :  { %v291_v3 = vadd.f32 %v290_v2, %v2011_v22  ;;  %v437_v6 = vmax.f32 %v287_v61, 0.0  ;;  %1587 = vmatprep.subr.bf16.mxu0 %v1855_v15  ;;  %v1749_v61 = vld [vmem:[#allocation2 + $0xa8] sm:$0xff]   ;;  %v1751_v63 = vld [vmem:[#allocation2 + $0xb8] sm:$0xff]  }
 0x134   :  { %v439_v5 = vmax.f32 %v289_v1, 0.0  ;;  %v1752_v2 = vld [vmem:[%s2164_s6 + $0x8] ss:$12 sps:$4 sm:$0xff]  }
 0x135   :  { %v440_v7 = vmax.f32 %v291_v3, 0.0  ;;  %v1759_v3 = vld [vmem:[#allocation5 + $0x58] sm:$0xff]  }
 0x136   :  { %v1673_v9 = vpack.c.bf16 %v439_v5, %v436_v4  ;;  %1588 = vmatpush3.bf16.msra.mxu0 %v1732_v8  ;;  %v1760_v4 = vld [vmem:[#allocation5 + $0x18] sm:$0xff]   ;;  %v1761_v5 = vld [vmem:[#allocation5 + $0x60] sm:$0xff]   ;;  %v1764_v8 = vld [vmem:[#allocation5 + $0x28] sm:$0xff]  }
 0x137   :  { %v1671_v10 = vpack.c.bf16 %v440_v7, %v437_v6  ;;  %v294_v11 = vpop.f32.mrb[28].mxu0  ;;  %1589 = vmatprep.subr.bf16.mxu0 %v1855_v15  ;;  %v1762_v6 = vld [vmem:[#allocation5 + $0x20] sm:$0xff]   ;;  %v1763_v7 = vld [vmem:[#allocation5 + $0x68] sm:$0xff]  }
 0x138   :  { %v295_v12 = vadd.f32 %v294_v11, %v2007_v21  ;;  %v296_v13 = vpop.f32.mrb[29].mxu0  ;;  %v1767_v11 = vld [vmem:[#allocation5 + $0x78] sm:$0xff]  }
 0x139   :  { %v297_v16 = vadd.f32 %v296_v13, %v2011_v22  ;;  %v298_v19 = vpop.f32.mrb[30].mxu0  ;;  %1672 = vmatprep.subr.bf16.mxu1 %v1671_v10  ;;  %v1766_v10 = vld [vmem:[#allocation5 + $0x30] sm:$0xff]   ;;  %v1769_v13 = vld [vmem:[#allocation5 + $0x80] sm:$0xff]  }
 0x13a   :  { %v299_v25 = vadd.f32 %v298_v19, %v2007_v21  ;;  %v300_v26 = vpop.f32.mrb[31].mxu0  ;;  %1674 = vmatpush1.bf16.msra.mxu1 %v1673_v9  ;;  %v442_v28 = vmax.f32 %v295_v12, 0.0  ;;  %1590 = vmatpush3.bf16.msra.mxu0 %v1734_v24  ;;  %v1725_v21 = vld [vmem:[#allocation2] sm:$0xff]   ;;  %v1765_v9 = vld [vmem:[#allocation5 + $0x70] sm:$0xff]   ;;  %v1768_v12 = vld [vmem:[#allocation5 + $0x38] sm:$0xff]  }
 0x13b   :  { %v301_v27 = vadd.f32 %v300_v26, %v2011_v22  ;;  %v443_v31 = vmax.f32 %v297_v16, 0.0  ;;  %1591 = vmatprep.subr.bf16.mxu0 %v1855_v15  ;;  %v1727_v22 = vld [vmem:[#allocation2 + $0x8] sm:$0xff]   ;;  %v1771_v19 = vld [vmem:[#allocation5 + $0x90] sm:$0xff]   ;;  %v1772_v24 = vld [vmem:[#allocation5 + $0x98] sm:$0xff]  }
 0x13c   :  { %v445_v30 = vmax.f32 %v299_v25, 0.0  ;;  %v1770_v16 = vld [vmem:[#allocation5 + $0x88] sm:$0xff]   ;;  %v1773_v25 = vld [vmem:[#allocation5 + $0xa0] sm:$0xff]  }
 0x13d   :  { %v446_v32 = vmax.f32 %v301_v27, 0.0  ;;  %v1774_v26 = vld [vmem:[#allocation5 + $0xa8] sm:$0xff]   ;;  %v1775_v27 = vld [vmem:[#allocation5 + $0xb0] sm:$0xff]  }
 0x13e   :  { %v1677_v34 = vpack.c.bf16 %v445_v30, %v442_v28  ;;  %1592 = vmatpush3.bf16.msra.mxu0 %v1736_v33  ;;  %v1776_v28 = vld [vmem:[#allocation5 + $0xb8] sm:$0xff]  }
 0x13f   :  { %v1675_v35 = vpack.c.bf16 %v446_v32, %v443_v31  ;;  %1593 = vmatprep.subr.bf16.mxu0 %v1855_v15 }
 0x141   :  { %1676 = vmatprep.subr.bf16.mxu1 %v1675_v35 }
 0x142   :  { %1678 = vmatpush1.bf16.msra.mxu1 %v1677_v34  ;;  %1594 = vmatpush3.bf16.msra.mxu0 %v1738_v29 }
 0x143   :  { %1561 = vmatprep.subr.bf16.mxu1 %v1855_v15  ;;  %1595 = vmatprep.subr.bf16.mxu0 %v1855_v15 }
 0x145   :  { %514 = vmatmul.mubr.f32.vlgmr.msra.gmra.mrb[16].mxu1 %v448_v14 }
 0x146   :  { %1562 = vmatpush3.bf16.msra.mxu1 %v1725_v21  ;;  %1577 = vmatprep.mubr.msk.bf16.mxu1 %vm1856_vm2, %v1855_v15 }
 0x147   :  { %1563 = vmatprep.subr.bf16.mxu1 %v1855_v15  ;;  %1596 = vmatpush3.bf16.msra.mxu0 %v1740_v42 }
 0x148   :  { %932 = vmatprep.subr.bf16.mxu0 %v1745_v43 }
 0x14a   :  { %1564 = vmatpush3.bf16.msra.mxu1 %v1727_v22  ;;  %v1016_v22 = vld [vmem:[%s2165_s7] sm:$0x7] }
 0x14b   :  { %1565 = vmatprep.subr.bf16.mxu1 %v1855_v15 }
 0x14e   :  { %1566 = vmatpush3.bf16.msra.mxu1 %v1729_v36  ;;  %v1021_v36 = vrot.slane %v1016_v22, %v89_v18 }
 0x14f   :  { %1567 = vmatprep.subr.bf16.mxu1 %v1855_v15 }
 0x152   :  { %1568 = vmatpush3.bf16.msra.mxu1 %v1731_v37 }
 0x153   :  { %1569 = vmatprep.subr.bf16.mxu1 %v1855_v15 }
 0x156   :  { %1570 = vmatpush3.bf16.msra.mxu1 %v1733_v38 }
 0x157   :  { %1571 = vmatprep.subr.bf16.mxu1 %v1855_v15 }
 0x15a   :  { %1572 = vmatpush3.bf16.msra.mxu1 %v1735_v39 }
 0x15b   :  { %1573 = vmatprep.subr.bf16.mxu1 %v1855_v15 }
 0x15e   :  { %1574 = vmatpush3.bf16.msra.mxu1 %v1737_v40 }
 0x15f   :  { %1575 = vmatprep.subr.bf16.mxu1 %v1855_v15 }
 0x162   :  { %1576 = vmatpush3.bf16.msra.mxu1 %v1739_v41 }
 0x163   :  { %1601 = vmatprep.subr.bf16.mxu1 %v1855_v15 }
 0x1fc   :  { %v586_v44 = vpop.f32.mrb[32].mxu0 }
 0x1fd   :  { %v1560_v45 = vpop.f32.mrb[33].mxu0  ;;  %v592_v1 = vpack.c.bf16 %v586_v44, %v586_v44 }
 0x218   :  { %v515_v46 = vpop.f32.mrb[16].mxu1 }
 0x219   :  { %v590_v48 = vpack.c.bf16 %v515_v46, %v515_v46  ;;  %v517_v49 = vpop.f32.mrb[17].mxu1 }
 0x21a   :  { %v591_v14 = vpack.c.bf16 %v517_v49, %v517_v49 }
 0x21b   :  { %1578 = vmatmul.mubr.bf16.vlgmr.msra.gmra.mrb[20].mxu1 %v590_v48 }
 0x21c   :  { %1602 = vmatpush3.bf16.msra.mxu1 %v1741_v47  ;;  %1598 = vmatmul.mubr.bf16.vlgmr.msra.gmra.mrb[36].mxu0 %v591_v14 }
 0x21d   :  { %1603 = vmatprep.subr.bf16.mxu1 %v1855_v15  ;;  %933 = vmatpush1.bf16.msra.mxu0 %v1743_v50 }
 0x21e   :  { %964 = vmatprep.mubr.bf16.mxu0 %v1853_v0  ;;  %1617 = vmatprep.mubr.msk.bf16.mxu1 %vm1856_vm2, %v1855_v15  ;;  %v1756_v0 = vld [vmem:[#allocation5 + $0x8] sm:$0xff]  }
 0x21f   :  { %1477 = vmatprep.subr.bf16.mxu0 %v1753_v51 }
 0x220   :  { %1604 = vmatpush3.bf16.msra.mxu1 %v1742_v52 }
 0x221   :  { %1605 = vmatprep.subr.bf16.mxu1 %v1855_v15 }
 0x224   :  { %1606 = vmatpush3.bf16.msra.mxu1 %v1746_v53  ;;  %1395 = vmatmul.mubr.msk.bf16.vlgmr.msra.gmra.mrb[40].mxu0 %vm928_vm3, %v907_v54 }
 0x225   :  { %1607 = vmatprep.subr.bf16.mxu1 %v1855_v15  ;;  %1478 = vmatpush3.bf16.msra.mxu0 %v1754_v55 }
 0x226   :  { %1479 = vmatprep.subr.bf16.mxu0 %v1755_v56 }
 0x228   :  { %1608 = vmatpush3.bf16.msra.mxu1 %v1747_v57 }
 0x229   :  { %1609 = vmatprep.subr.bf16.mxu1 %v1855_v15  ;;  %1480 = vmatpush3.bf16.msra.mxu0 %v1756_v0 }
 0x22a   :  { %1481 = vmatprep.subr.bf16.mxu0 %v1757_v58 }
 0x22c   :  { %1610 = vmatpush3.bf16.msra.mxu1 %v1748_v59 }
 0x22d   :  { %1611 = vmatprep.subr.bf16.mxu1 %v1855_v15  ;;  %1482 = vmatpush3.bf16.msra.mxu0 %v1758_v60 }
 0x22e   :  { %1483 = vmatprep.subr.bf16.mxu0 %v1759_v3 }
 0x230   :  { %1612 = vmatpush3.bf16.msra.mxu1 %v1749_v61 }
 0x231   :  { %1613 = vmatprep.subr.bf16.mxu1 %v1855_v15  ;;  %1484 = vmatpush3.bf16.msra.mxu0 %v1760_v4 }
 0x232   :  { %1485 = vmatprep.subr.bf16.mxu0 %v1761_v5 }
 0x234   :  { %1614 = vmatpush3.bf16.msra.mxu1 %v1750_v62 }
 0x235   :  { %1615 = vmatprep.subr.bf16.mxu1 %v1855_v15  ;;  %1486 = vmatpush3.bf16.msra.mxu0 %v1762_v6 }
 0x236   :  { %1487 = vmatprep.subr.bf16.mxu0 %v1763_v7 }
 0x238   :  { %1616 = vmatpush3.bf16.msra.mxu1 %v1751_v63 }
 0x239   :  { %1621 = vmatprep.subr.bf16.mxu1 %v1855_v15  ;;  %1488 = vmatpush3.bf16.msra.mxu0 %v1764_v8 }
 0x23a   :  { %1489 = vmatprep.subr.bf16.mxu0 %v1765_v9 }
 0x23b   :  { %1618 = vmatmul.mubr.bf16.vlgmr.msra.gmra.mrb[24].mxu1 %v592_v1 }
 0x23c   :  { %1622 = vmatpush3.bf16.msra.mxu1 %v1752_v2  ;;  %1623 = vmatprep.mubr.msk.bf16.mxu1 %vm1856_vm2, %v1855_v15 }
 0x23d   :  { %1627 = vmatprep.subr.bf16.mxu1 %v1855_v15  ;;  %1490 = vmatpush3.bf16.msra.mxu0 %v1766_v10 }
 0x23e   :  { %1491 = vmatprep.subr.bf16.mxu0 %v1767_v11 }
 0x241   :  { %1492 = vmatpush3.bf16.msra.mxu0 %v1768_v12 }
 0x243   :  { %1624 = vmatmul.mubr.msk.bf16.vlgmr.msra.gmra.mrb[28].mxu1 %vm928_vm3, %v907_v54 }
 0x244   :  { %1643 = vmatprep.mubr.msk.bf16.mxu1 %vm1856_vm2, %v1855_v15  ;;  %1628 = vmatpush3.bf16.msra.mxu1 %v1769_v13 }
 0x245   :  { %1629 = vmatprep.subr.bf16.mxu1 %v1855_v15 }
 0x248   :  { %1630 = vmatpush3.bf16.msra.mxu1 %v1770_v16 }
 0x249   :  { %1631 = vmatprep.subr.bf16.mxu1 %v1855_v15 }
 0x24c   :  { %1632 = vmatpush3.bf16.msra.mxu1 %v1771_v19 }
 0x24d   :  { %1633 = vmatprep.subr.bf16.mxu1 %v1855_v15 }
 0x250   :  { %1634 = vmatpush3.bf16.msra.mxu1 %v1772_v24 }
 0x251   :  { %1635 = vmatprep.subr.bf16.mxu1 %v1855_v15 }
 0x254   :  { %1636 = vmatpush3.bf16.msra.mxu1 %v1773_v25 }
 0x255   :  { %1637 = vmatprep.subr.bf16.mxu1 %v1855_v15 }
 0x258   :  { %1638 = vmatpush3.bf16.msra.mxu1 %v1774_v26 }
 0x259   :  { %1639 = vmatprep.subr.bf16.mxu1 %v1855_v15 }
 0x25c   :  { %1640 = vmatpush3.bf16.msra.mxu1 %v1775_v27 }
 0x25d   :  { %1641 = vmatprep.subr.bf16.mxu1 %v1855_v15  ;;  %v1025_v15 = vrot.slane %v1016_v22, %v93_v20  ;;  %v1029_v20 = vrot.slane %v1016_v22, %v97_v23 }
 0x260   :  { %1642 = vmatpush3.bf16.msra.mxu1 %v1776_v28 }
 0x2ee   :  { %v691_v30 = vpop.f32.mrb[20].mxu1 }
 0x2ef   :  { %v1579_v31 = vpop.f32.mrb[21].mxu1  ;;  %v796_v32 = vpop.f32.mrb[36].mxu0 }
 0x2f0   :  { %v694_v33 = vpop.f32.mrb[22].mxu1  ;;  %v1599_v34 = vpop.f32.mrb[37].mxu0 }
 0x2f1   :  { %v1580_v35 = vpop.f32.mrb[23].mxu1  ;;  %v799_v29 = vpop.f32.mrb[38].mxu0 }
 0x2f2   :  { %v1600_v21 = vpop.f32.mrb[39].mxu0 }
 0x2f7   :  { %v966_v37 = vpop.f32.mrb[40].mxu0 }
 0x2f8   :  { %v1013_v38 = vadd.f32 %v966_v37, %v691_v30  ;;  %v968_v39 = vpop.f32.mrb[41].mxu0 }
 0x2f9   :  { %v1014_v40 = vadd.f32 %v968_v39, %v796_v32  ;;  %v970_v41 = vpop.f32.mrb[42].mxu0 }
 0x2fa   :  { %v1033_v42 = vadd.f32 %v1021_v36, %v1013_v38  ;;  %v971_v43 = vpop.f32.mrb[43].mxu0 }
 0x2fb   :  { %v1034_v44 = vadd.f32 %v1025_v15, %v1014_v40 }
 0x2fc   :  { %v1036_v45 = vmax.f32 %v1033_v42, 0.0 }
 0x2fd   :  { %v1037_v46 = vmax.f32 %v1034_v44, 0.0 }
 0x2fe   :  { %v1039_v48 = vpack.c.bf16 %v1036_v45, %v1036_v45 }
 0x2ff   :  { %v1040_v47 = vpack.c.bf16 %v1037_v46, %v1037_v46 }
 0x301   :  { %1266 = vmatprep.mubr.bf16.mxu0 %v1040_v47 }
 0x302   :  { %1267 = vmatmul.mubr.bf16.vlgmr.msra.gmra.mrb[44].mxu0 %v1039_v48 }
 0x30e   :  { %v901_v49 = vpop.f32.mrb[24].mxu1 }
 0x30f   :  { %v1619_v50 = vpop.f32.mrb[25].mxu1 }
 0x310   :  { %v904_v18 = vpop.f32.mrb[26].mxu1 }
 0x311   :  { %v1620_v14 = vpop.f32.mrb[27].mxu1 }
 0x316   :  { %v1007_v51 = vpop.f32.mrb[28].mxu1 }
 0x317   :  { %v1015_v52 = vadd.f32 %v1007_v51, %v901_v49  ;;  %v1625_v53 = vpop.f32.mrb[29].mxu1 }
 0x318   :  { %v1010_v54 = vpop.f32.mrb[30].mxu1 }
 0x319   :  { %v1035_v55 = vadd.f32 %v1029_v20, %v1015_v52  ;;  %v1626_v56 = vpop.f32.mrb[31].mxu1 }
 0x31b   :  { %v1038_v57 = vmax.f32 %v1035_v55, 0.0 }
 0x31d   :  { %v1041_v0 = vpack.c.bf16 %v1038_v57, %v1038_v57 }
 0x31f   :  { %1644 = vmatmul.mubr.bf16.vlgmr.msra.gmra.mrb[32].mxu1 %v1041_v0 }
 0x3d5   :  { %v1493_v58 = vpop.f32.mrb[44].mxu0 }
 0x3d6   :  { %v1494_v59 = vpop.f32.mrb[45].mxu0 }
 0x3d7   :  { %v1495_v60 = vadd.f32 %v1494_v59, %v1493_v58  ;;  %v1496_v61 = vpop.f32.mrb[46].mxu0 }
 0x3d8   :  { %v1497_v62 = vpop.f32.mrb[47].mxu0 }
 0x3f2   :  { %v1308_v63 = vpop.f32.mrb[32].mxu1 }
 0x3f3   :  { %v1309_v1 = vadd.f32 %v1495_v60, %v1308_v63  ;;  %v1645_v2 = vpop.f32.mrb[33].mxu1 }
 0x3f4   :  { %v1311_v23 = vpop.f32.mrb[34].mxu1 }
 0x3f5   :  { %v1314_v3 = vmul.f32 0.33333334, %v1309_v1  ;;  %v1646_v4 = vpop.f32.mrb[35].mxu1 }
 0x3f7   :  { %v1322_v5 = vadd.f32 %v1421_v17, %v1314_v3 }
 0x3f9   :  { %1323 = vst [vmem:[#allocation7] sm:$0xff] %v1322_v5 }
 0x3fa   :  { %1832 = shalt.err (!%p1829_p6)
}
 0x3fb   :  { %s1833_s30 = scalar_lea.hbm %s2168_s10, 128 }
 0x3fc   :  { %p1834_p7 = scmp.ne.s32.totalorder %s2168_s10, %s1833_s30  ;;  %p1837_p8 = scmp.lt.u32.totalorder %s1833_s30, %s2168_s10 }
 0x3fe   :  { %p1839_p9 = pnand %p1837_p8, %p1834_p7 }
 0x400   :  { %1842 = shalt.err (!%p1839_p9)
}
 0x401   :  { %1333 = dma.vmem_to_hbm [thread:$0]  %s1331_s27, 128, %s2168_s10, [#allocation4]  }
 0x402   :  { %1847 = dma.done.wait [#allocation4], 128  }
 0x403   :  { %1848 = vsyncadd [#allocation4], 4294967168 }
 0x404   :  { %1337 = vsyncpa [#allocation3], 1 }
 0x405   :  { %1338 = vsyncpa [#allocation6], 1 }
 0x406   :  { %1339 = vsyncpa [#allocation4], 1 }

</bundles_post_ra>
